<compile_context>
chip_gen: v5e
topology: v5e:2x2
jax: 0.10.0
libtpu: 0.0.40
codegen_flags: <defaults>
</compile_context>

<pallas_src>
import functools

import jax
import jax.numpy as jnp
from jax.experimental import pallas as pl
from jax.experimental.pallas import tpu as pltpu


def _round_up(x, m):
    return ((x + m - 1) // m) * m


def _cdiv(a, b):
    return (a + b - 1) // b


def pn_kernel(x_ref, w1t_ref, b1_ref, w2t_ref, b2_ref, out_ref):
    # x: [TB, n_in]   w1t: [n_in, n_hid]   b1: [1, n_hid]
    # w2t: [n_hid, n_act]   b2: [1, n_act]   out: [TB, n_act]
    x = x_ref[...]
    h = jnp.dot(x, w1t_ref[...], preferred_element_type=jnp.float32)     # MXU
    h = jnp.maximum(h + b1_ref[...], 0.0)                                # bias + ReLU (VPU)
    logits = jnp.dot(h, w2t_ref[...],
                     preferred_element_type=jnp.float32) + b2_ref[...]   # MXU

    # Numerically stable softmax over the action (lane) axis.  The 4-wide
    # reductions go to the otherwise-idle XLU; the divide is exact so rows
    # sum to 1 to f32 precision (fixes the failed normalization check).
    m = jnp.max(logits, axis=-1, keepdims=True)
    e = jnp.exp(logits - m)                                              # EUP
    s = jnp.sum(e, axis=-1, keepdims=True)
    out_ref[...] = e / s


@functools.partial(jax.jit, static_argnames=("tb_max",))
def pn_forward(state, w1, b1, w2, b2, *, tb_max=4096):
    """state: [B, n_inputs] (or [n_inputs]) -> probs: [B, n_actions] f32.

    Weights are in torch nn.Linear layout: w1 [n_hid, n_in], w2 [n_act, n_hid];
    biases [n_hid], [n_act].
    """
    if state.ndim == 1:                      # mirror PN._format's unsqueeze(0)
        state = state[None, :]
    state = state.astype(jnp.float32)

    B, n_in = state.shape
    n_hid = w1.shape[0]
    n_act = w2.shape[0]

    # Pre-transpose the tiny weights (trace-time, ~1 KiB total) so the kernel
    # runs in natural row-major orientation and `state` streams from HBM with
    # no transpose / pad copy.
    w1t = jnp.asarray(w1, jnp.float32).T                  # [n_in, n_hid]
    w2t = jnp.asarray(w2, jnp.float32).T                  # [n_hid, n_act]
    b1r = jnp.asarray(b1, jnp.float32).reshape(1, n_hid)  # [1, n_hid]
    b2r = jnp.asarray(b2, jnp.float32).reshape(1, n_act)  # [1, n_act]

    # Batch tile (sublane axis).  Small batch: single full-array block, zero
    # padding, one grid step.  Large batch: multiple of 8, capped at tb_max,
    # and sized for >= 4 grid steps (v7x megacore sharding).
    if B <= tb_max:
        tb = B
    else:
        tb = max(8, min(tb_max, _round_up(_cdiv(B, 4), 8)))
    nsteps = _cdiv(B, tb)

    bytes_accessed = 4 * (B * (n_in + n_act)
                          + w1t.size + b1r.size + w2t.size + b2r.size)

    probs = pl.pallas_call(
        pn_kernel,
        out_shape=jax.ShapeDtypeStruct((B, n_act), jnp.float32),
        grid=(nsteps,),
        in_specs=[
            pl.BlockSpec((tb, n_in), lambda i: (i, 0)),      # streamed activations
            pl.BlockSpec((n_in, n_hid), lambda i: (0, 0)),   # VMEM-resident weights
            pl.BlockSpec((1, n_hid), lambda i: (0, 0)),
            pl.BlockSpec((n_hid, n_act), lambda i: (0, 0)),
            pl.BlockSpec((1, n_act), lambda i: (0, 0)),
        ],
        out_specs=pl.BlockSpec((tb, n_act), lambda i: (i, 0)),
        compiler_params=pltpu.CompilerParams(
            dimension_semantics=("parallel",),
            vmem_limit_bytes=32 * 1024 * 1024,
        ),
        cost_estimate=pl.CostEstimate(
            flops=2 * B * (n_in * n_hid + n_hid * n_act),
            transcendentals=B * n_act,
            bytes_accessed=bytes_accessed,
        ),
    )(state, w1t, b1r, w2t, b2r)

    return probs                              # [B, n_actions]


def init_params(key, n_inputs, n_actions, n_hidden):
    # Deterministic synthetic init (uniform, torch-Linear-like fan_in bound),
    # stored in torch layout: W [out, in], b [out].
    k1, k2, k3, k4 = jax.random.split(key, 4)
    bound1 = 1.0 / (n_inputs ** 0.5)
    bound2 = 1.0 / (n_hidden ** 0.5)
    w1 = jax.random.uniform(k1, (n_hidden, n_inputs), jnp.float32, -bound1, bound1)
    b1 = jax.random.uniform(k2, (n_hidden,), jnp.float32, -bound1, bound1)
    w2 = jax.random.uniform(k3, (n_actions, n_hidden), jnp.float32, -bound2, bound2)
    b2 = jax.random.uniform(k4, (n_actions,), jnp.float32, -bound2, bound2)
    return w1, b1, w2, b2


if __name__ == "__main__":
    key = jax.random.PRNGKey(0)
    n_inputs, n_actions, n_hidden = 8, 4, 32
    batch = 2

    k_params, k_state, k_state2, k_state3 = jax.random.split(key, 4)
    w1, b1, w2, b2 = init_params(k_params, n_inputs, n_actions, n_hidden)

    def ref(s):
        h = jnp.maximum(s @ w1.T + b1, 0.0)
        return jax.nn.softmax(h @ w2.T + b2, axis=1)

    # Small batch (single grid step, no padding, zero extra copies).
    state = jax.random.normal(k_state, (batch, n_inputs), jnp.float32)
    probs = jax.block_until_ready(pn_forward(state, w1, b1, w2, b2))
    assert probs.shape == (batch, n_actions)
    assert jnp.allclose(probs, ref(state), atol=2e-3), "mismatch vs reference (small batch)"
    assert jnp.allclose(jnp.sum(probs, axis=1), 1.0, atol=1e-3)

    # Larger batch exercising multiple pipelined grid steps + ragged tail block.
    batch2 = 300
    state2 = jax.random.normal(k_state2, (batch2, n_inputs), jnp.float32)
    probs2 = jax.block_until_ready(pn_forward(state2, w1, b1, w2, b2, tb_max=128))
    assert probs2.shape == (batch2, n_actions)
    assert jnp.allclose(probs2, ref(state2), atol=2e-3), "mismatch vs reference (multi-tile)"
    assert jnp.allclose(jnp.sum(probs2, axis=1), 1.0, atol=1e-3)

    # 1-D state path (mirrors PN._format's unsqueeze(0)).
    state1d = jax.random.normal(k_state3, (n_inputs,), jnp.float32)
    probs1d = jax.block_until_ready(pn_forward(state1d, w1, b1, w2, b2))
    assert probs1d.shape == (1, n_actions)
    assert jnp.allclose(probs1d, ref(state1d[None, :]), atol=2e-3)

    # TODO(synk): get_action's Categorical sampling / log_prob / .item() is
    # host-side policy logic, intentionally not part of the device kernel.
    print("KERNEL_OK")
</pallas_src>

<mosaic_0001>
module attributes {stable_mosaic.version = 11 : i64} {
  func.func @pn_kernel(%arg0: i32, %arg1: memref<2x8xf32, #tpu.memory_space<vmem>>, %arg2: memref<8x32xf32, #tpu.memory_space<vmem>>, %arg3: memref<1x32xf32, #tpu.memory_space<vmem>>, %arg4: memref<32x4xf32, #tpu.memory_space<vmem>>, %arg5: memref<1x4xf32, #tpu.memory_space<vmem>>, %arg6: memref<2x4xf32, #tpu.memory_space<vmem>>) attributes {dimension_semantics = [#tpu.dimension_semantics<parallel>], iteration_bounds = array<i64: 1>, scalar_prefetch = 0 : i64, scratch_operands = 0 : i64, tpu.core_type = #tpu.core_type<tc>, window_params = [{transform_indices = @transform_0, window_bounds = array<i64: 2, 8>}, {pipeline_mode = #tpu.pipeline_mode<synchronous>, transform_indices = @transform_1, window_bounds = array<i64: 8, 32>}, {pipeline_mode = #tpu.pipeline_mode<synchronous>, transform_indices = @transform_2, window_bounds = array<i64: 1, 32>}, {pipeline_mode = #tpu.pipeline_mode<synchronous>, transform_indices = @transform_3, window_bounds = array<i64: 32, 4>}, {pipeline_mode = #tpu.pipeline_mode<synchronous>, transform_indices = @transform_4, window_bounds = array<i64: 1, 4>}, {transform_indices = @transform_5, window_bounds = array<i64: 2, 4>}]} {
    %c0 = arith.constant 0 : index
    %c0_0 = arith.constant 0 : index
    %0 = vector.load %arg1[%c0, %c0_0] : memref<2x8xf32, #tpu.memory_space<vmem>>, vector<2x8xf32>
    %c0_1 = arith.constant 0 : index
    %c0_2 = arith.constant 0 : index
    %1 = vector.load %arg2[%c0_1, %c0_2] : memref<8x32xf32, #tpu.memory_space<vmem>>, vector<8x32xf32>
    %cst = arith.constant dense<0.000000e+00> : vector<2x32xf32>
    %2 = tpu.matmul %0, %1, %cst {dimension_numbers = #tpu.dot_dimension_numbers<[1], [0], [0], [1], [0, 0, 1, 1], [], []>} : vector<2x8xf32>, vector<8x32xf32>, vector<2x32xf32> -> vector<2x32xf32>
    %c0_3 = arith.constant 0 : index
    %c0_4 = arith.constant 0 : index
    %3 = vector.load %arg3[%c0_3, %c0_4] : memref<1x32xf32, #tpu.memory_space<vmem>>, vector<1x32xf32>
    %4 = vector.broadcast %3 : vector<1x32xf32> to vector<2x32xf32>
    %5 = arith.addf %2, %4 : vector<2x32xf32>
    %cst_5 = arith.constant 0.000000e+00 : f32
    %6 = vector.broadcast %cst_5 : f32 to vector<2x32xf32>
    %7 = arith.maximumf %5, %6 : vector<2x32xf32>
    %c0_6 = arith.constant 0 : index
    %c0_7 = arith.constant 0 : index
    %8 = vector.load %arg4[%c0_6, %c0_7] : memref<32x4xf32, #tpu.memory_space<vmem>>, vector<32x4xf32>
    %cst_8 = arith.constant dense<0.000000e+00> : vector<2x4xf32>
    %9 = tpu.matmul %7, %8, %cst_8 {dimension_numbers = #tpu.dot_dimension_numbers<[1], [0], [0], [1], [0, 0, 1, 1], [], []>} : vector<2x32xf32>, vector<32x4xf32>, vector<2x4xf32> -> vector<2x4xf32>
    %c0_9 = arith.constant 0 : index
    %c0_10 = arith.constant 0 : index
    %10 = vector.load %arg5[%c0_9, %c0_10] : memref<1x4xf32, #tpu.memory_space<vmem>>, vector<1x4xf32>
    %11 = vector.broadcast %10 : vector<1x4xf32> to vector<2x4xf32>
    %12 = arith.addf %9, %11 : vector<2x4xf32>
    %cst_11 = arith.constant dense<0xFF800000> : vector<2xf32>
    %13 = vector.multi_reduction <maximumf>, %12, %cst_11 [1] : vector<2x4xf32> to vector<2xf32>
    %14 = vector.shape_cast %13 : vector<2xf32> to vector<2x1xf32>
    %15 = vector.broadcast %14 : vector<2x1xf32> to vector<2x4xf32>
    %16 = arith.subf %12, %15 : vector<2x4xf32>
    %17 = math.exp %16 : vector<2x4xf32>
    %cst_12 = arith.constant dense<0.000000e+00> : vector<2xf32>
    %18 = vector.multi_reduction <add>, %17, %cst_12 [1] : vector<2x4xf32> to vector<2xf32>
    %19 = vector.shape_cast %18 : vector<2xf32> to vector<2x1xf32>
    %20 = vector.broadcast %19 : vector<2x1xf32> to vector<2x4xf32>
    %21 = arith.divf %17, %20 : vector<2x4xf32>
    %c0_13 = arith.constant 0 : index
    %c0_14 = arith.constant 0 : index
    %22 = vector.load %arg6[%c0_13, %c0_14] : memref<2x4xf32, #tpu.memory_space<vmem>>, vector<2x4xf32>
    tpu.vector_store %arg6[%c0_13, %c0_14], %21 {strides = array<i32>} : memref<2x4xf32, #tpu.memory_space<vmem>>, vector<2x4xf32>,
    return
  }
  func.func @transform_0(%arg0: i32) -> (i32, i32) {
    %c0_i32 = arith.constant 0 : i32
    %c0_i32_0 = arith.constant 0 : i32
    return %arg0, %c0_i32 : i32, i32
  }
  func.func @transform_1(%arg0: i32) -> (i32, i32) {
    %c0_i32 = arith.constant 0 : i32
    %c0_i32_0 = arith.constant 0 : i32
    %c0_i32_1 = arith.constant 0 : i32
    return %c0_i32, %c0_i32_0 : i32, i32
  }
  func.func @transform_2(%arg0: i32) -> (i32, i32) {
    %c0_i32 = arith.constant 0 : i32
    %c0_i32_0 = arith.constant 0 : i32
    %c0_i32_1 = arith.constant 0 : i32
    return %c0_i32, %c0_i32_0 : i32, i32
  }
  func.func @transform_3(%arg0: i32) -> (i32, i32) {
    %c0_i32 = arith.constant 0 : i32
    %c0_i32_0 = arith.constant 0 : i32
    %c0_i32_1 = arith.constant 0 : i32
    return %c0_i32, %c0_i32_0 : i32, i32
  }
  func.func @transform_4(%arg0: i32) -> (i32, i32) {
    %c0_i32 = arith.constant 0 : i32
    %c0_i32_0 = arith.constant 0 : i32
    %c0_i32_1 = arith.constant 0 : i32
    return %c0_i32, %c0_i32_0 : i32, i32
  }
  func.func @transform_5(%arg0: i32) -> (i32, i32) {
    %c0_i32 = arith.constant 0 : i32
    %c0_i32_0 = arith.constant 0 : i32
    return %arg0, %c0_i32 : i32, i32
  }
}

</mosaic_0001>

<bundles_post_ra>
// kernel: pn_forward.1
= control target key start
LH: loop header
LB: loop body
LE: loop exit
PB: predicated region body
PF: predicated region fallthrough
CT: control target
= control target key end

     0   :  { %vm27_vm0 = vcmask 64512   ;;  %s222_s0 = inlined_call_operand.vmem [shape: f32[2,8], index: 0, kind: input, shape index: {}]   ;;  %s223_s1 = inlined_call_operand.vmem [shape: f32[8,32], index: 1, kind: input, shape index: {}]   ;;  %s224_s2 = inlined_call_operand.vmem [shape: f32[1,32], index: 2, kind: input, shape index: {}]   ;;  %s225_s3 = inlined_call_operand.vmem [shape: f32[32,4], index: 3, kind: input, shape index: {}]   ;;  %s226_s4 = inlined_call_operand.vmem [shape: f32[1,4], index: 4, kind: input, shape index: {}]   ;;  %s227_s5 = inlined_call_operand.hbm [shape: f32[2,4], index: 5, kind: output, shape index: {}]  }
   0x1   :  { %v22_v0 = vld [vmem:[%s223_s1] sm:$0xff]  ;;  %v55_v2 = vld [vmem:[%s225_s3 + $0x18] sm:$0xff] }
   0x2   :  { %v21_v1 = vld [vmem:[%s222_s0] sm:$0x3]  ;;  %46 = vmatpush.msra.mxu0 %v22_v0  ;;  %76 = vmatpush.msra.mxu1 %v55_v2 }
   0x3   :  { %126 = vmatmul.msk.f32.vlgmr.msra.gmra.mxu0 %vm27_vm0, %v21_v1 }
   0x4   :  { %10 = vsyncpa [#allocation3], 0  ;;  %v54_v3 = vld [vmem:[%s225_s3 + $0x10] sm:$0xff]  ;;  %v53_v4 = vld [vmem:[%s225_s3 + $0x8] sm:$0xff]  ;;  %vm60_vm1 = vcmask 261120   ;;  %vm84_vm2 = vcmask 25600  }
   0x5   :  { %77 = vmatpush.msra.mxu1 %v54_v3  ;;  %v52_v5 = vld [vmem:[%s225_s3] sm:$0xff]  ;;  %s117_s8 = sshll.u32 %s227_s5, 4  ;;  %s118_s8 = int_to_ptr.hbm [resolvable:$true] %s117_s8 }
   0x6   :  { %v129_v6 = vld [vmem:[%s224_s2] ss:$0 sm:$0xff]  ;;  %s161_s2 = smov [#allocation2]  }
   0x7   :  { %78 = vmatpush.msra.mxu1 %v53_v4  ;;  %v130_v10 = vld [vmem:[%s226_s4] ss:$0 sm:$0xff]  ;;  %s115_s3 = sshll.u32 %s161_s2, 4  ;;  %s116_s3 = int_to_ptr.vmem [resolvable:$true] %s115_s3 }
   0x9   :  { %79 = vmatpush.msra.mxu1 %v52_v5 }
  0x80   :  { %v48_v7 = vpop.f32.mrf.mxu0 }
  0x81   :  { %v49_v8 = vadd.f32 %v129_v6, %v48_v7 }
  0x83   :  { %v51_v9 = vmax.f32 %v49_v8, 0.0 }
  0x85   :  { %127 = vmatmul.msk.f32.vlgmr.msra.gmra.mxu1 %vm60_vm1, %v51_v9 }
 0x102   :  { %v81_v11 = vpop.f32.mrf.mxu1 }
 0x103   :  { %v82_v12 = vadd.f32 %v130_v10, %v81_v11 }
 0x105   :  { %v85_v13 = vsel %vm84_vm2, %v82_v12, -inf }
 0x106   :  { %86 = vmax.xlane.f32.xlu0 %v85_v13 }
 0x179   :  { %v87_v14 = vpop.xlane.xlu0 %86 }
 0x17a   :  { %v88_v15 = vsub.f32 %v82_v12, %v87_v14 }
 0x17c   :  { %v89_v16 = vmul.f32 1.442695, %v88_v15 }
 0x17e   :  { %131 = vpow2.f32 %v89_v16 }
 0x184   :  { %v132_v17 = vpop.eup %131 }
 0x185   :  { %v91_v18 = vsel %vm84_vm2, %v132_v17, 0.0 }
 0x186   :  { %92 = vadd.xlane.f32.xlu0 %v91_v18 }
 0x1f9   :  { %v93_v19 = vpop.xlane.xlu0 %92 }
 0x1fa   :  { %133 = vrcp.f32 %v93_v19  ;;  %v105_v23 = vand.u32 2147483648, %v93_v19  ;;  %v103_v25 = vand.u32 2147483647, %v93_v19  ;;  %vm99_vm4 = vweird.f32 %v93_v19 }
 0x1fc   :  { %v106_v27 = vor.u32 1.1754944e-38, %v105_v23  ;;  %vm104_vm6 = vcmp.eq.f32.partialorder %v103_v25, 8.507059e+37 }
 0x200   :  { %v134_v20 = vpop.eup %133 }
 0x201   :  { %v95_v21 = vmul.f32 %v134_v20, %v93_v19  ;;  %vm100_vm3 = vweird.f32 %v134_v20 }
 0x202   :  { %vm101_vm5 = vmor %vm99_vm4, %vm100_vm3 }
 0x203   :  { %v96_v22 = vsub.f32 1.0, %v95_v21 }
 0x205   :  { %v97_v24 = vmul.f32 %v134_v20, %v96_v22 }
 0x207   :  { %v98_v26 = vadd.f32 %v134_v20, %v97_v24 }
 0x209   :  { %v102_v28 = vsel %vm101_vm5, %v134_v20, %v98_v26 }
 0x20a   :  { %v107_v29 = vsel %vm104_vm6, %v106_v27, %v102_v28 }
 0x20b   :  { %v108_v30 = vmul.f32 %v132_v17, %v107_v29 }
 0x20d   :  { %109 = vst.msk [vmem:[#allocation2] sm:$0x3] %vm84_vm2, %v108_v30 }
 0x20e   :  { %120 = dma.vmem_to_hbm [thread:$0]  %s116_s3, 32, %s118_s8, [#allocation3]  }
 0x20f   :  { %159 = dma.done.wait [#allocation3], 32  }
 0x210   :  { %160 = vsyncadd [#allocation3], 4294967264 }
 0x211   :  { %125 = vsyncpa [#allocation3], 1 }

</bundles_post_ra>
